<compile_context>
chip_gen: v7x
topology: tpu7x:2x2x1
jax: 0.10.0
libtpu: 0.0.40
codegen_flags: <defaults>
</compile_context>

<pallas_src>
import functools

import jax
import jax.numpy as jnp
import numpy as np
from jax.experimental import pallas as pl
from jax.experimental.pallas import tpu as pltpu


def _ffsd_kernel(num_layers, *refs):
    """One batch tile of the full forward pass.

    refs = (x, w_0, b_0, ..., w_{L-1}, b_{L-1}, w_fc, b_fc, group_mat, out)
      x         : [tile, lookback*data_dim]            f32  (pipelined)
      w_i       : [in_i, hidden]                       bf16 (resident)
      b_i       : [1, hidden]                          f32  (resident)
      w_fc      : [hidden, data_dim*n_classes]         bf16 (resident)
      b_fc      : [1, data_dim*n_classes]              f32  (resident)
      group_mat : [DN, DN] block-diagonal ones         bf16 (resident)
      out       : [tile, data_dim*n_classes]           f32  (pipelined, lane-dense)
    """
    x_ref = refs[0]
    layer_refs = refs[1:1 + 2 * num_layers]
    wfc_ref = refs[1 + 2 * num_layers]
    bfc_ref = refs[2 + 2 * num_layers]
    gmat_ref = refs[3 + 2 * num_layers]
    out_ref = refs[4 + 2 * num_layers]

    # MLP trunk: bf16 inputs into the MXU, f32 accumulation; bias/ReLU in f32.
    h = x_ref[...]
    for i in range(num_layers):
        w = layer_refs[2 * i][...]
        b = layer_refs[2 * i + 1][...]                       # [1, hidden]
        acc = jnp.dot(h.astype(w.dtype), w, preferred_element_type=jnp.float32)
        h = jnp.maximum(acc + b, 0.0)

    y = jnp.dot(h.astype(wfc_ref.dtype), wfc_ref[...],
                preferred_element_type=jnp.float32) + bfc_ref[...]

    # Grouped softmax over contiguous n_classes-wide groups, vectorized over
    # the whole lane-dense [tile, data_dim*n_classes] slab.  Softmax is
    # invariant to any per-row shift, so the row max (one cheap XLU lane
    # reduction) is a valid stabilizer for every group.  (Groups whose logits
    # sit >~90 below the row max would underflow to 0/0 -- impossible at this
    # model's logit scale, so no per-group max pass is done.)
    y = y - jnp.max(y, axis=-1, keepdims=True)
    e = jnp.exp(y)                                           # f32

    # Per-group sums broadcast back to every lane via a tiny block-diagonal
    # indicator matmul.  Split e into exact hi/lo bf16 parts so the MXU
    # (single-pass bf16) result is accurate to ~1e-5 on every backend — this
    # is what makes the softmax sum to 1 within tight tolerance.
    g = gmat_ref[...]                                        # bf16 0/1, exact
    e_hi = e.astype(jnp.bfloat16)
    e_lo = (e - e_hi.astype(jnp.float32)).astype(jnp.bfloat16)
    gsum = (jnp.dot(e_hi, g, preferred_element_type=jnp.float32)
            + jnp.dot(e_lo, g, preferred_element_type=jnp.float32))

    # Exact f32 divide (tiny slab; cost negligible, accuracy exact).
    out_ref[...] = e / gsum


def ffsd_forward(x, params, *, data_dim, discretization, batch_tile=2048):
    """x: [batch, lookback, data_dim] f32 -> [batch, data_dim, 2*disc+1] f32."""
    hidden_ws, hidden_bs, w_fc, b_fc = params
    num_layers = len(hidden_ws)
    n_classes = 2 * discretization + 1
    dn = data_dim * n_classes
    hidden_dim = w_fc.shape[0]

    batch = x.shape[0]
    in_dim = x.shape[1] * x.shape[2]
    x2 = x.reshape(batch, in_dim)                            # [batch, lookback*data_dim]

    # Batch tile: large enough to pipeline DMAs against compute, small enough
    # to fit comfortably inside v7x's 64 MiB VMEM (tightest of v5e/v6e/v7x).
    assert batch_tile % 8 == 0
    tb = batch if batch <= batch_tile else batch_tile
    padded = ((batch + tb - 1) // tb) * tb
    if padded != batch:
        x2 = jnp.concatenate(
            [x2, jnp.zeros((padded - batch, in_dim), x2.dtype)], axis=0)
    grid = (padded // tb,)

    # Block-diagonal group-indicator matrix (bf16 0/1 — exact; resident).
    rows = np.arange(dn)[:, None] // n_classes
    cols = np.arange(dn)[None, :] // n_classes
    gmat = jnp.asarray((rows == cols).astype(np.float32)).astype(jnp.bfloat16)

    resident = lambda i: (0, 0)                              # weights: same block every step
    args = [x2]
    in_specs = [pl.BlockSpec((tb, in_dim), lambda i: (i, 0))]
    for w, b in zip(hidden_ws, hidden_bs):
        args += [w.astype(jnp.bfloat16), b.reshape(1, -1).astype(jnp.float32)]
        in_specs += [pl.BlockSpec(w.shape, resident),
                     pl.BlockSpec((1, w.shape[1]), resident)]
    args += [w_fc.astype(jnp.bfloat16),
             b_fc.reshape(1, -1).astype(jnp.float32),
             gmat]
    in_specs += [pl.BlockSpec(w_fc.shape, resident),
                 pl.BlockSpec((1, dn), resident),
                 pl.BlockSpec((dn, dn), resident)]
    out_specs = pl.BlockSpec((tb, dn), lambda i: (i, 0))

    # Cost estimate: helps XLA schedule the custom call inside a larger graph.
    flops = 2 * padded * (in_dim * hidden_dim
                          + hidden_dim * hidden_dim * max(num_layers - 1, 0)
                          + hidden_dim * dn + 2 * dn * dn)
    transcendentals = 2 * padded * dn                        # exp + divide
    weight_bytes = sum(int(np.prod(a.shape)) * a.dtype.itemsize for a in args[1:])
    bytes_accessed = padded * in_dim * 4 + padded * dn * 4 + weight_bytes
    cost = pl.CostEstimate(flops=int(flops),
                           transcendentals=int(transcendentals),
                           bytes_accessed=int(bytes_accessed))

    # Scoped-VMEM budget: double-buffered x/out tiles + resident weights +
    # live intermediates, 2x headroom, clamped under v7x's 64 MiB physical VMEM.
    tile_bytes = 2 * (tb * in_dim * 4 + tb * dn * 4)         # pipelined buffers
    tile_bytes += 4 * tb * (hidden_dim + 4 * dn)             # live intermediates
    tile_bytes += 2 * weight_bytes
    vmem_limit = int(min(max(2 * tile_bytes, 16 * 2**20), 56 * 2**20))

    kernel = functools.partial(_ffsd_kernel, num_layers)
    out_flat = pl.pallas_call(
        kernel,
        grid=grid,
        in_specs=in_specs,
        out_specs=out_specs,
        out_shape=jax.ShapeDtypeStruct((padded, dn), jnp.float32),
        compiler_params=pltpu.CompilerParams(
            dimension_semantics=("parallel",),
            vmem_limit_bytes=vmem_limit),
        cost_estimate=cost,
    )(*args)

    # Row-major reshape is free; slice drops the batch padding.
    return out_flat[:batch].reshape(batch, data_dim, n_classes)


def init_params(key, data_dim, hidden_dim, lookback, num_layers, discretization):
    """Deterministic synthetic parameter init (shapes match the nn.Module)."""
    n_classes = 2 * discretization + 1
    in_dim = lookback * data_dim
    keys = jax.random.split(key, 2 * num_layers + 2)

    hidden_ws, hidden_bs = [], []
    prev = in_dim
    for i in range(num_layers):
        w = jax.random.normal(keys[2 * i], (prev, hidden_dim), jnp.float32) * 0.1
        b = jax.random.normal(keys[2 * i + 1], (hidden_dim,), jnp.float32) * 0.1
        hidden_ws.append(w)
        hidden_bs.append(b)
        prev = hidden_dim

    w_fc = jax.random.normal(keys[-2], (hidden_dim, n_classes * data_dim),
                             jnp.float32) * 0.1
    b_fc = jax.random.normal(keys[-1], (n_classes * data_dim,), jnp.float32) * 0.1
    return hidden_ws, hidden_bs, w_fc, b_fc


def ffsd_reference(x, params, *, data_dim, discretization):
    """Pure-JAX f32 reference of the PyTorch forward."""
    hidden_ws, hidden_bs, w_fc, b_fc = params
    n_classes = 2 * discretization + 1
    batch = x.shape[0]
    h = x.reshape(batch, -1)
    for w, b in zip(hidden_ws, hidden_bs):
        h = jnp.maximum(h @ w + b, 0.0)
    y = h @ w_fc + b_fc
    y = y.reshape(batch, data_dim, n_classes)
    return jax.nn.softmax(y, axis=2)


if __name__ == "__main__":
    data_dim, lookback = 4, 8
    hidden_dim, discretization = 32, 2
    n_classes = 2 * discretization + 1

    key = jax.random.PRNGKey(0)
    kx1, kx2, kp1, kp2 = jax.random.split(key, 4)

    # --- small smoke test: batch=2, single grid step ------------------------
    num_layers = 1
    params1 = init_params(kp1, data_dim, hidden_dim, lookback, num_layers,
                          discretization)
    x_small = jax.random.normal(kx1, (2, lookback, data_dim), jnp.float32)
    out_small = jax.block_until_ready(
        ffsd_forward(x_small, params1, data_dim=data_dim,
                     discretization=discretization))
    ref_small = ffsd_reference(x_small, params1, data_dim=data_dim,
                               discretization=discretization)
    assert out_small.shape == (2, data_dim, n_classes)
    np.testing.assert_allclose(np.asarray(out_small), np.asarray(ref_small),
                               rtol=2e-2, atol=5e-3)
    np.testing.assert_allclose(np.asarray(out_small).sum(-1), 1.0,
                               rtol=0, atol=1e-3)

    # --- larger batch: exercises pipelined grid, batch padding, 2-layer trunk
    num_layers = 2
    params2 = init_params(kp2, data_dim, hidden_dim, lookback, num_layers,
                          discretization)
    x_big = jax.random.normal(kx2, (4100, lookback, data_dim), jnp.float32)
    out_big = jax.block_until_ready(
        ffsd_forward(x_big, params2, data_dim=data_dim,
                     discretization=discretization, batch_tile=1024))
    ref_big = ffsd_reference(x_big, params2, data_dim=data_dim,
                             discretization=discretization)
    assert out_big.shape == (4100, data_dim, n_classes)
    np.testing.assert_allclose(np.asarray(out_big), np.asarray(ref_big),
                               rtol=2e-2, atol=5e-3)
    np.testing.assert_allclose(np.asarray(out_big).sum(-1), 1.0,
                               rtol=0, atol=1e-3)

    print("KERNEL_OK")
</pallas_src>

<mosaic_0001>
module attributes {stable_mosaic.version = 11 : i64} {
  func.func @_ffsd_kernel(%arg0: i32, %arg1: memref<2x32xf32, #tpu.memory_space<vmem>>, %arg2: memref<32x32xbf16, #tpu.memory_space<vmem>>, %arg3: memref<1x32xf32, #tpu.memory_space<vmem>>, %arg4: memref<32x20xbf16, #tpu.memory_space<vmem>>, %arg5: memref<1x20xf32, #tpu.memory_space<vmem>>, %arg6: memref<20x20xbf16, #tpu.memory_space<vmem>>, %arg7: memref<2x20xf32, #tpu.memory_space<vmem>>) attributes {dimension_semantics = [#tpu.dimension_semantics<parallel>], iteration_bounds = array<i64: 1>, scalar_prefetch = 0 : i64, scratch_operands = 0 : i64, tpu.core_type = #tpu.core_type<tc>, window_params = [{transform_indices = @transform_0, window_bounds = array<i64: 2, 32>}, {pipeline_mode = #tpu.pipeline_mode<synchronous>, transform_indices = @transform_1, window_bounds = array<i64: 32, 32>}, {pipeline_mode = #tpu.pipeline_mode<synchronous>, transform_indices = @transform_2, window_bounds = array<i64: 1, 32>}, {pipeline_mode = #tpu.pipeline_mode<synchronous>, transform_indices = @transform_3, window_bounds = array<i64: 32, 20>}, {pipeline_mode = #tpu.pipeline_mode<synchronous>, transform_indices = @transform_4, window_bounds = array<i64: 1, 20>}, {pipeline_mode = #tpu.pipeline_mode<synchronous>, transform_indices = @transform_5, window_bounds = array<i64: 20, 20>}, {transform_indices = @transform_6, window_bounds = array<i64: 2, 20>}]} {
    %c0 = arith.constant 0 : index
    %c0_0 = arith.constant 0 : index
    %0 = vector.load %arg1[%c0, %c0_0] : memref<2x32xf32, #tpu.memory_space<vmem>>, vector<2x32xf32>
    %c0_1 = arith.constant 0 : index
    %c0_2 = arith.constant 0 : index
    %1 = vector.load %arg2[%c0_1, %c0_2] : memref<32x32xbf16, #tpu.memory_space<vmem>>, vector<32x32xbf16>
    %c0_3 = arith.constant 0 : index
    %c0_4 = arith.constant 0 : index
    %2 = vector.load %arg3[%c0_3, %c0_4] : memref<1x32xf32, #tpu.memory_space<vmem>>, vector<1x32xf32>
    %3 = arith.truncf %0 : vector<2x32xf32> to vector<2x32xbf16>
    %cst = arith.constant dense<0.000000e+00> : vector<2x32xf32>
    %4 = tpu.matmul %3, %1, %cst {dimension_numbers = #tpu.dot_dimension_numbers<[1], [0], [0], [1], [0, 0, 1, 1], [], []>} : vector<2x32xbf16>, vector<32x32xbf16>, vector<2x32xf32> -> vector<2x32xf32>
    %5 = vector.broadcast %2 : vector<1x32xf32> to vector<2x32xf32>
    %6 = arith.addf %4, %5 : vector<2x32xf32>
    %cst_5 = arith.constant 0.000000e+00 : f32
    %7 = vector.broadcast %cst_5 : f32 to vector<2x32xf32>
    %8 = arith.maximumf %6, %7 : vector<2x32xf32>
    %9 = arith.truncf %8 : vector<2x32xf32> to vector<2x32xbf16>
    %c0_6 = arith.constant 0 : index
    %c0_7 = arith.constant 0 : index
    %10 = vector.load %arg4[%c0_6, %c0_7] : memref<32x20xbf16, #tpu.memory_space<vmem>>, vector<32x20xbf16>
    %cst_8 = arith.constant dense<0.000000e+00> : vector<2x20xf32>
    %11 = tpu.matmul %9, %10, %cst_8 {dimension_numbers = #tpu.dot_dimension_numbers<[1], [0], [0], [1], [0, 0, 1, 1], [], []>} : vector<2x32xbf16>, vector<32x20xbf16>, vector<2x20xf32> -> vector<2x20xf32>
    %c0_9 = arith.constant 0 : index
    %c0_10 = arith.constant 0 : index
    %12 = vector.load %arg5[%c0_9, %c0_10] : memref<1x20xf32, #tpu.memory_space<vmem>>, vector<1x20xf32>
    %13 = vector.broadcast %12 : vector<1x20xf32> to vector<2x20xf32>
    %14 = arith.addf %11, %13 : vector<2x20xf32>
    %cst_11 = arith.constant dense<0xFF800000> : vector<2xf32>
    %15 = vector.multi_reduction <maximumf>, %14, %cst_11 [1] : vector<2x20xf32> to vector<2xf32>
    %16 = vector.shape_cast %15 : vector<2xf32> to vector<2x1xf32>
    %17 = vector.broadcast %16 : vector<2x1xf32> to vector<2x20xf32>
    %18 = arith.subf %14, %17 : vector<2x20xf32>
    %19 = math.exp %18 : vector<2x20xf32>
    %c0_12 = arith.constant 0 : index
    %c0_13 = arith.constant 0 : index
    %20 = vector.load %arg6[%c0_12, %c0_13] : memref<20x20xbf16, #tpu.memory_space<vmem>>, vector<20x20xbf16>
    %21 = arith.truncf %19 : vector<2x20xf32> to vector<2x20xbf16>
    %22 = arith.extf %21 : vector<2x20xbf16> to vector<2x20xf32>
    %23 = arith.subf %19, %22 : vector<2x20xf32>
    %24 = arith.truncf %23 : vector<2x20xf32> to vector<2x20xbf16>
    %cst_14 = arith.constant dense<0.000000e+00> : vector<2x20xf32>
    %25 = tpu.matmul %21, %20, %cst_14 {dimension_numbers = #tpu.dot_dimension_numbers<[1], [0], [0], [1], [0, 0, 1, 1], [], []>} : vector<2x20xbf16>, vector<20x20xbf16>, vector<2x20xf32> -> vector<2x20xf32>
    %cst_15 = arith.constant dense<0.000000e+00> : vector<2x20xf32>
    %26 = tpu.matmul %24, %20, %cst_15 {dimension_numbers = #tpu.dot_dimension_numbers<[1], [0], [0], [1], [0, 0, 1, 1], [], []>} : vector<2x20xbf16>, vector<20x20xbf16>, vector<2x20xf32> -> vector<2x20xf32>
    %27 = arith.addf %25, %26 : vector<2x20xf32>
    %28 = arith.divf %19, %27 : vector<2x20xf32>
    %c0_16 = arith.constant 0 : index
    %c0_17 = arith.constant 0 : index
    %29 = vector.load %arg7[%c0_16, %c0_17] : memref<2x20xf32, #tpu.memory_space<vmem>>, vector<2x20xf32>
    tpu.vector_store %arg7[%c0_16, %c0_17], %28 {strides = array<i32>} : memref<2x20xf32, #tpu.memory_space<vmem>>, vector<2x20xf32>,
    return
  }
  func.func @transform_0(%arg0: i32) -> (i32, i32) {
    %c0_i32 = arith.constant 0 : i32
    %c0_i32_0 = arith.constant 0 : i32
    return %arg0, %c0_i32 : i32, i32
  }
  func.func @transform_1(%arg0: i32) -> (i32, i32) {
    %c0_i32 = arith.constant 0 : i32
    %c0_i32_0 = arith.constant 0 : i32
    %c0_i32_1 = arith.constant 0 : i32
    return %c0_i32, %c0_i32_0 : i32, i32
  }
  func.func @transform_2(%arg0: i32) -> (i32, i32) {
    %c0_i32 = arith.constant 0 : i32
    %c0_i32_0 = arith.constant 0 : i32
    %c0_i32_1 = arith.constant 0 : i32
    return %c0_i32, %c0_i32_0 : i32, i32
  }
  func.func @transform_3(%arg0: i32) -> (i32, i32) {
    %c0_i32 = arith.constant 0 : i32
    %c0_i32_0 = arith.constant 0 : i32
    %c0_i32_1 = arith.constant 0 : i32
    return %c0_i32, %c0_i32_0 : i32, i32
  }
  func.func @transform_4(%arg0: i32) -> (i32, i32) {
    %c0_i32 = arith.constant 0 : i32
    %c0_i32_0 = arith.constant 0 : i32
    %c0_i32_1 = arith.constant 0 : i32
    return %c0_i32, %c0_i32_0 : i32, i32
  }
  func.func @transform_5(%arg0: i32) -> (i32, i32) {
    %c0_i32 = arith.constant 0 : i32
    %c0_i32_0 = arith.constant 0 : i32
    %c0_i32_1 = arith.constant 0 : i32
    return %c0_i32, %c0_i32_0 : i32, i32
  }
  func.func @transform_6(%arg0: i32) -> (i32, i32) {
    %c0_i32 = arith.constant 0 : i32
    %c0_i32_0 = arith.constant 0 : i32
    return %arg0, %c0_i32 : i32, i32
  }
}

</mosaic_0001>

<bundles_post_ra>
// kernel: tpu_custom_call.1
= control target key start
LH: loop header
LB: loop body
LE: loop exit
PB: predicated region body
PF: predicated region fallthrough
CT: control target
= control target key end

     0   :  { %v390_v1 = vmov 0.0   ;;  %vm391_vm0 = vmmov 0   ;;  %s475_s0 = inlined_call_operand.vmem [shape: f32[2,32], index: 0, kind: input, shape index: {}]   ;;  %s476_s1 = inlined_call_operand.vmem [shape: bf16[32,32], index: 1, kind: input, shape index: {}]   ;;  %s477_s2 = inlined_call_operand.vmem [shape: f32[1,32], index: 2, kind: input, shape index: {}]   ;;  %s478_s3 = inlined_call_operand.vmem [shape: bf16[32,20], index: 3, kind: input, shape index: {}]   ;;  %s479_s4 = inlined_call_operand.vmem [shape: f32[1,20], index: 4, kind: input, shape index: {}]   ;;  %s480_s5 = inlined_call_operand.vmem [shape: bf16[20,20], index: 5, kind: input, shape index: {}]   ;;  %s481_s6 = inlined_call_operand.hbm [shape: f32[2,20], index: 6, kind: output, shape index: {}]  }
   0x1   :  { %v356_v0 = vld [vmem:[%s476_s1] sm:$0xff]   ;;  %317 = vmatprep.subr.bf16.mxu1 %v390_v1  ;;  %333 = vmatprep.subr.bf16.mxu0 %v390_v1  ;;  %v357_v2 = vld [vmem:[%s476_s1 + $0x8] sm:$0xff]  }
   0x2   :  { %318 = vmatpush3.bf16.msra.mxu1 %v356_v0  ;;  %321 = vmatprep.mubr.msk.bf16.mxu1 %vm391_vm0, %v390_v1  ;;  %v25_v3 = vld [vmem:[%s475_s0] sm:$0x3] }
   0x3   :  { %319 = vmatprep.subr.bf16.mxu1 %v390_v1  ;;  %337 = vmatprep.mubr.msk.bf16.mxu0 %vm391_vm0, %v390_v1  ;;  %v31_v4 = vpack.c.bf16 %v25_v3, %v25_v3 }
   0x4   :  { %11 = vsyncpa [#allocation3], 0  ;;  %vm50_vm1 = vcmask 261120   ;;  %v358_v5 = vld [vmem:[%s478_s3] sm:$0xff]   ;;  %v359_v6 = vld [vmem:[%s478_s3 + $0x8] sm:$0xff]   ;;  %vm162_vm2 = vcmask 156672  }
   0x5   :  { %v293_v7 = vld [vmem:[%s477_s2] ss:$0 sm:$0xff]  ;;  %v361_v23 = vld [vmem:[%s480_s5 + $0x8] ss:$0 sps:$4 sm:$0x33]   ;;  %vm189_vm3 = vcmask 1041408  }
   0x6   :  { %320 = vmatpush3.bf16.msra.mxu1 %v357_v2  ;;  %v297_v15 = vld [vmem:[%s479_s4] ss:$0 sm:$0xff]  ;;  %v191_v24 = vsel %vm189_vm3, %v361_v23, 0  ;;  %vm185_vm4 = vcmask 162816   ;;  %s392_s4 = smov [#allocation2]  }
   0x7   :  { %325 = vmatprep.subr.bf16.mxu1 %v390_v1  ;;  %v360_v22 = vld [vmem:[%s480_s5] sm:$0xff]   ;;  %s285_s5 = sshll.u32 %s392_s4, 4  ;;  %s286_s5 = int_to_ptr.vmem [resolvable:$true] %s285_s5 }
   0x8   :  { %334 = vmatpush3.bf16.msra.mxu0 %v360_v22  ;;  %s366_s11 = scalar_lea.vmem %s286_s5, 32  ;;  %p371_p1 = scmp.lt.s32.totalorder %s286_s5, %s286_s5 }
   0x9   :  { %322 = vmatmul.mubr.msk.bf16.vlgmr.msra.gmra.mrb[0].mxu1 %vm50_vm1, %v31_v4  ;;  %335 = vmatprep.subr.bf16.mxu0 %v390_v1  ;;  %p367_p0 = scmp.ne.s32.totalorder %s286_s5, %s366_s11  ;;  %p372_p2 = scmp.lt.s32.totalorder %s366_s11, %s366_s11 }
   0xa   :  { %326 = vmatpush3.bf16.msra.mxu1 %v358_v5  ;;  %329 = vmatprep.mubr.msk.bf16.mxu1 %vm391_vm0, %v390_v1 }
   0xb   :  { %327 = vmatprep.subr.bf16.mxu1 %v390_v1  ;;  %p373_p3 = por %p372_p2, %p371_p1 }
   0xc   :  { %336 = vmatpush3.bf16.msra.mxu0 %v191_v24 }
   0xd   :  { %341 = vmatprep.subr.bf16.mxu0 %v390_v1  ;;  %p374_p4 = pnand %p373_p3, %p367_p0 }
   0xe   :  { %328 = vmatpush3.bf16.msra.mxu1 %v359_v6 }
  0xdc   :  { %v88_v8 = vpop.f32.mrb[0].mxu1 }
  0xdd   :  { %v89_v9 = vadd.f32 %v293_v7, %v88_v8  ;;  %v323_v10 = vpop.f32.mrb[1].mxu1 }
  0xde   :  { %v91_v11 = vpop.f32.mrb[2].mxu1 }
  0xdf   :  { %v94_v12 = vmax.f32 %v89_v9, 0.0  ;;  %v324_v13 = vpop.f32.mrb[3].mxu1 }
  0xe1   :  { %v95_v14 = vpack.c.bf16 %v94_v12, %v94_v12 }
  0xe3   :  { %330 = vmatmul.mubr.msk.bf16.vlgmr.msra.gmra.mrb[4].mxu1 %vm50_vm1, %v95_v14 }
 0x1b6   :  { %v156_v16 = vpop.f32.mrb[4].mxu1 }
 0x1b7   :  { %v157_v17 = vadd.f32 %v297_v15, %v156_v16  ;;  %v331_v18 = vpop.f32.mrb[5].mxu1 }
 0x1b8   :  { %v159_v19 = vpop.f32.mrb[6].mxu1 }
 0x1b9   :  { %v332_v20 = vpop.f32.mrb[7].mxu1  ;;  %v163_v21 = vsel %vm162_vm2, %v157_v17, -inf }
 0x1ba   :  { %164 = vmax.xlane.f32.xlu0 %v163_v21 }
 0x247   :  { %v165_v25 = vpop.xlane.xlu0 %164 }
 0x248   :  { %v166_v26 = vsub.f32 %v157_v17, %v165_v25 }
 0x24a   :  { %v167_v27 = vmul.f32 1.442695, %v166_v26 }
 0x24c   :  { %362 = vpow2.f32 %v167_v27 }
 0x256   :  { %v363_v28 = vpop.eup %362 }
 0x257   :  { %v172_v29 = vpack.c.bf16 %v363_v28, %v363_v28 }
 0x259   :  { %v173_v30 = vunpack.c.l.bf16 %v172_v29 }
 0x25b   :  { %v174_v31 = vsub.f32 %v363_v28, %v173_v30 }
 0x25d   :  { %v175_v32 = vpack.c.bf16 %v174_v31, %v174_v31 }
 0x25f   :  { %338 = vmatmul.mubr.msk.bf16.vlgmr.msra.gmra.mrb[0].mxu0 %vm185_vm4, %v175_v32 }
 0x260   :  { %342 = vmatpush3.bf16.msra.mxu0 %v360_v22  ;;  %345 = vmatprep.mubr.msk.bf16.mxu0 %vm391_vm0, %v390_v1 }
 0x261   :  { %343 = vmatprep.subr.bf16.mxu0 %v390_v1 }
 0x264   :  { %344 = vmatpush3.bf16.msra.mxu0 %v191_v24 }
 0x26b   :  { %346 = vmatmul.mubr.msk.bf16.vlgmr.msra.gmra.mrb[0].mxu0 %vm185_vm4, %v172_v29 }
 0x33e   :  { %v270_v33 = vpop.f32.mrb[0].mxu0 }
 0x33f   :  { %364 = vrcp.f32 %v270_v33  ;;  %v347_v34 = vpop.f32.mrb[1].mxu0 }
 0x340   :  { %v273_v35 = vpop.f32.mrb[2].mxu0 }
 0x341   :  { %v348_v36 = vpop.f32.mrb[3].mxu0 }
 0x349   :  { %v365_v37 = vpop.eup %364 }
 0x34a   :  { %v277_v38 = vmul.f32 %v365_v37, %v363_v28 }
 0x34c   :  { %278 = vst.msk [vmem:[#allocation2] sm:$0x3] %vm162_vm2, %v277_v38 }
 0x34d   :  { %377 = shalt.err (!%p374_p4)
}
 0x34e   :  { %s378_s14 = scalar_lea.hbm %s481_s6, 32 }
 0x34f   :  { %p379_p5 = scmp.ne.s32.totalorder %s481_s6, %s378_s14  ;;  %p382_p6 = scmp.lt.u32.totalorder %s378_s14, %s481_s6 }
 0x351   :  { %p384_p7 = pnand %p382_p6, %p379_p5 }
 0x353   :  { %387 = shalt.err (!%p384_p7)
}
 0x354   :  { %288 = dma.vmem_to_hbm [thread:$0]  %s286_s5, 32, %s481_s6, [#allocation3]  }
 0x355   :  { %388 = dma.done.wait [#allocation3], 32  }
 0x356   :  { %389 = vsyncadd [#allocation3], 4294967264 }
 0x357   :  { %292 = vsyncpa [#allocation3], 1 }

</bundles_post_ra>
